<compile_context>
chip_gen: v6e
topology: v6e:2x2x1
jax: 0.10.0
libtpu: 0.0.40
codegen_flags: <defaults>
</compile_context>

<pallas_src>
import jax
import jax.numpy as jnp
from jax.experimental import pallas as pl
from jax.experimental.pallas import tpu as pltpu


# (in_features, out_features) for the 8 Linear layers, PyTorch order.
LAYER_DIMS = [
    (28 * 28, 128), (128, 64), (64, 12), (12, 3),      # encoder
    (3, 12), (12, 64), (64, 128), (128, 28 * 28),      # decoder
]
# activation applied AFTER each layer (matches nn.Sequential in the spec)
LAYER_ACTS = ["relu", "relu", "relu", None,            # encoder ends with plain Linear
              "relu", "relu", "relu", "tanh"]          # decoder ends with Tanh


# -----------------------------------------------------------------------------
# Fused Pallas kernel: one batch tile flows through the entire network in VMEM.
# -----------------------------------------------------------------------------
def _autoencoder_kernel(x_ref, *refs):
    # refs layout: w1, b1, w2, b2, ..., w8, b8, enc_ref, dec_ref
    wb = refs[:16]
    enc_ref, dec_ref = refs[16], refs[17]

    def dense(h, idx):
        w = wb[2 * idx][...]
        b = wb[2 * idx + 1][...]                      # (1, dout) broadcasts over rows
        y = jnp.dot(h, w, preferred_element_type=jnp.float32) + b
        act = LAYER_ACTS[idx]
        if act == "relu":
            y = jnp.maximum(y, 0.0)
        elif act == "tanh":
            y = jnp.tanh(y)
        return y

    h = x_ref[...].astype(jnp.float32)
    # encoder
    h = dense(h, 0)
    h = dense(h, 1)
    h = dense(h, 2)
    e = dense(h, 3)                                   # encode (no activation)
    enc_ref[...] = e.astype(enc_ref.dtype)
    # decoder
    d = dense(e, 4)
    d = dense(d, 5)
    d = dense(d, 6)
    d = dense(d, 7)                                   # tanh
    dec_ref[...] = d.astype(dec_ref.dtype)


# -----------------------------------------------------------------------------
# Wrapper
# -----------------------------------------------------------------------------
def autoencoder_forward(x, params):
    """x: (M, 784) -> (encode (M, 3), decode (M, 784)), single fused Pallas call."""
    M, D = x.shape
    assert D == 28 * 28

    # Batch tile: one tile for small batches (rounded up to 8 sublanes),
    # 128-row tiles (parallel grid -> megacore) for large batches.
    TM = 128 if M >= 128 else 8 * ((M + 7) // 8)
    Mp = TM * ((M + TM - 1) // TM)
    x_pad = jnp.pad(x, ((0, Mp - M), (0, 0))) if Mp != M else x

    weight_args = []
    in_specs = [pl.BlockSpec((TM, D), lambda i: (i, 0))]
    for li, (din, dout) in enumerate(LAYER_DIMS):
        w = params[f"w{li + 1}"]                      # (din, dout), already GEMM layout
        b = params[f"b{li + 1}"].reshape(1, dout)
        weight_args += [w, b]
        # Full blocks with constant index_map -> VMEM-resident across the batch grid.
        in_specs += [
            pl.BlockSpec((din, dout), lambda i: (0, 0)),
            pl.BlockSpec((1, dout), lambda i: (0, 0)),
        ]

    out_shapes = (
        jax.ShapeDtypeStruct((Mp, 3), x.dtype),
        jax.ShapeDtypeStruct((Mp, D), x.dtype),
    )
    out_specs = (
        pl.BlockSpec((TM, 3), lambda i: (i, 0)),
        pl.BlockSpec((TM, D), lambda i: (i, 0)),
    )

    enc, dec = pl.pallas_call(
        _autoencoder_kernel,
        out_shape=out_shapes,
        grid=(Mp // TM,),
        in_specs=in_specs,
        out_specs=out_specs,
        compiler_params=pltpu.CompilerParams(
            dimension_semantics=("parallel",)),
    )(x_pad, *weight_args)

    return enc[:M], dec[:M]


# -----------------------------------------------------------------------------
# Parameters (PyTorch nn.Linear default init; weights stored as (in, out))
# -----------------------------------------------------------------------------
def init_params(key):
    params = {}
    keys = jax.random.split(key, 2 * len(LAYER_DIMS))
    for li, (din, dout) in enumerate(LAYER_DIMS):
        bound = 1.0 / (din ** 0.5)
        params[f"w{li + 1}"] = jax.random.uniform(
            keys[2 * li], (din, dout), jnp.float32, -bound, bound)
        params[f"b{li + 1}"] = jax.random.uniform(
            keys[2 * li + 1], (dout,), jnp.float32, -bound, bound)
    return params


# Pure-JAX reference for correctness checking.
def _reference_forward(x, params):
    h = x
    outs = []
    for li in range(len(LAYER_DIMS)):
        h = h @ params[f"w{li + 1}"] + params[f"b{li + 1}"]
        act = LAYER_ACTS[li]
        if act == "relu":
            h = jnp.maximum(h, 0.0)
        elif act == "tanh":
            h = jnp.tanh(h)
        outs.append(h)
    return outs[3], outs[7]


if __name__ == "__main__":
    key = jax.random.PRNGKey(0)
    pkey, xkey = jax.random.split(key)
    params = init_params(pkey)

    # Small input consistent with the module: batch=2 flattened 28x28 images.
    x = jax.random.normal(xkey, (2, 28 * 28), jnp.float32)

    encode, decode = jax.jit(autoencoder_forward)(x, params)
    jax.block_until_ready((encode, decode))

    # shape / semantics checks
    assert encode.shape == (2, 3), encode.shape
    assert decode.shape == (2, 28 * 28), decode.shape
    assert bool(jnp.all(jnp.abs(decode) <= 1.0))      # decoder ends in tanh

    # numerical check against pure-JAX reference
    enc_ref, dec_ref = _reference_forward(x, params)
    assert bool(jnp.allclose(encode, enc_ref, atol=1e-4, rtol=1e-4))
    assert bool(jnp.allclose(decode, dec_ref, atol=1e-4, rtol=1e-4))

    print("KERNEL_OK")
</pallas_src>

<mosaic_0001>
module attributes {stable_mosaic.version = 11 : i64} {
  func.func @_autoencoder_kernel(%arg0: i32, %arg1: memref<8x784xf32, #tpu.memory_space<vmem>>, %arg2: memref<784x128xf32, #tpu.memory_space<vmem>>, %arg3: memref<1x128xf32, #tpu.memory_space<vmem>>, %arg4: memref<128x64xf32, #tpu.memory_space<vmem>>, %arg5: memref<1x64xf32, #tpu.memory_space<vmem>>, %arg6: memref<64x12xf32, #tpu.memory_space<vmem>>, %arg7: memref<1x12xf32, #tpu.memory_space<vmem>>, %arg8: memref<12x3xf32, #tpu.memory_space<vmem>>, %arg9: memref<1x3xf32, #tpu.memory_space<vmem>>, %arg10: memref<3x12xf32, #tpu.memory_space<vmem>>, %arg11: memref<1x12xf32, #tpu.memory_space<vmem>>, %arg12: memref<12x64xf32, #tpu.memory_space<vmem>>, %arg13: memref<1x64xf32, #tpu.memory_space<vmem>>, %arg14: memref<64x128xf32, #tpu.memory_space<vmem>>, %arg15: memref<1x128xf32, #tpu.memory_space<vmem>>, %arg16: memref<128x784xf32, #tpu.memory_space<vmem>>, %arg17: memref<1x784xf32, #tpu.memory_space<vmem>>, %arg18: memref<8x3xf32, #tpu.memory_space<vmem>>, %arg19: memref<8x784xf32, #tpu.memory_space<vmem>>) attributes {dimension_semantics = [#tpu.dimension_semantics<parallel>], iteration_bounds = array<i64: 1>, scalar_prefetch = 0 : i64, scratch_operands = 0 : i64, tpu.core_type = #tpu.core_type<tc>, window_params = [{transform_indices = @transform_0, window_bounds = array<i64: 8, 784>}, {pipeline_mode = #tpu.pipeline_mode<synchronous>, transform_indices = @transform_1, window_bounds = array<i64: 784, 128>}, {pipeline_mode = #tpu.pipeline_mode<synchronous>, transform_indices = @transform_2, window_bounds = array<i64: 1, 128>}, {pipeline_mode = #tpu.pipeline_mode<synchronous>, transform_indices = @transform_3, window_bounds = array<i64: 128, 64>}, {pipeline_mode = #tpu.pipeline_mode<synchronous>, transform_indices = @transform_4, window_bounds = array<i64: 1, 64>}, {pipeline_mode = #tpu.pipeline_mode<synchronous>, transform_indices = @transform_5, window_bounds = array<i64: 64, 12>}, {pipeline_mode = #tpu.pipeline_mode<synchronous>, transform_indices = @transform_6, window_bounds = array<i64: 1, 12>}, {pipeline_mode = #tpu.pipeline_mode<synchronous>, transform_indices = @transform_7, window_bounds = array<i64: 12, 3>}, {pipeline_mode = #tpu.pipeline_mode<synchronous>, transform_indices = @transform_8, window_bounds = array<i64: 1, 3>}, {pipeline_mode = #tpu.pipeline_mode<synchronous>, transform_indices = @transform_9, window_bounds = array<i64: 3, 12>}, {pipeline_mode = #tpu.pipeline_mode<synchronous>, transform_indices = @transform_10, window_bounds = array<i64: 1, 12>}, {pipeline_mode = #tpu.pipeline_mode<synchronous>, transform_indices = @transform_11, window_bounds = array<i64: 12, 64>}, {pipeline_mode = #tpu.pipeline_mode<synchronous>, transform_indices = @transform_12, window_bounds = array<i64: 1, 64>}, {pipeline_mode = #tpu.pipeline_mode<synchronous>, transform_indices = @transform_13, window_bounds = array<i64: 64, 128>}, {pipeline_mode = #tpu.pipeline_mode<synchronous>, transform_indices = @transform_14, window_bounds = array<i64: 1, 128>}, {pipeline_mode = #tpu.pipeline_mode<synchronous>, transform_indices = @transform_15, window_bounds = array<i64: 128, 784>}, {pipeline_mode = #tpu.pipeline_mode<synchronous>, transform_indices = @transform_16, window_bounds = array<i64: 1, 784>}, {transform_indices = @transform_17, window_bounds = array<i64: 8, 3>}, {transform_indices = @transform_18, window_bounds = array<i64: 8, 784>}]} {
    %c0 = arith.constant 0 : index
    %c0_0 = arith.constant 0 : index
    %0 = vector.load %arg1[%c0, %c0_0] : memref<8x784xf32, #tpu.memory_space<vmem>>, vector<8x784xf32>
    %c0_1 = arith.constant 0 : index
    %c0_2 = arith.constant 0 : index
    %1 = vector.load %arg2[%c0_1, %c0_2] : memref<784x128xf32, #tpu.memory_space<vmem>>, vector<784x128xf32>
    %c0_3 = arith.constant 0 : index
    %c0_4 = arith.constant 0 : index
    %2 = vector.load %arg3[%c0_3, %c0_4] : memref<1x128xf32, #tpu.memory_space<vmem>>, vector<1x128xf32>
    %cst = arith.constant dense<0.000000e+00> : vector<8x128xf32>
    %3 = tpu.matmul %0, %1, %cst {dimension_numbers = #tpu.dot_dimension_numbers<[1], [0], [0], [1], [0, 0, 1, 1], [], []>} : vector<8x784xf32>, vector<784x128xf32>, vector<8x128xf32> -> vector<8x128xf32>
    %4 = vector.broadcast %2 : vector<1x128xf32> to vector<8x128xf32>
    %5 = arith.addf %3, %4 : vector<8x128xf32>
    %cst_5 = arith.constant 0.000000e+00 : f32
    %6 = vector.broadcast %cst_5 : f32 to vector<8x128xf32>
    %7 = arith.maximumf %5, %6 : vector<8x128xf32>
    %c0_6 = arith.constant 0 : index
    %c0_7 = arith.constant 0 : index
    %8 = vector.load %arg4[%c0_6, %c0_7] : memref<128x64xf32, #tpu.memory_space<vmem>>, vector<128x64xf32>
    %c0_8 = arith.constant 0 : index
    %c0_9 = arith.constant 0 : index
    %9 = vector.load %arg5[%c0_8, %c0_9] : memref<1x64xf32, #tpu.memory_space<vmem>>, vector<1x64xf32>
    %cst_10 = arith.constant dense<0.000000e+00> : vector<8x64xf32>
    %10 = tpu.matmul %7, %8, %cst_10 {dimension_numbers = #tpu.dot_dimension_numbers<[1], [0], [0], [1], [0, 0, 1, 1], [], []>} : vector<8x128xf32>, vector<128x64xf32>, vector<8x64xf32> -> vector<8x64xf32>
    %11 = vector.broadcast %9 : vector<1x64xf32> to vector<8x64xf32>
    %12 = arith.addf %10, %11 : vector<8x64xf32>
    %cst_11 = arith.constant 0.000000e+00 : f32
    %13 = vector.broadcast %cst_11 : f32 to vector<8x64xf32>
    %14 = arith.maximumf %12, %13 : vector<8x64xf32>
    %c0_12 = arith.constant 0 : index
    %c0_13 = arith.constant 0 : index
    %15 = vector.load %arg6[%c0_12, %c0_13] : memref<64x12xf32, #tpu.memory_space<vmem>>, vector<64x12xf32>
    %c0_14 = arith.constant 0 : index
    %c0_15 = arith.constant 0 : index
    %16 = vector.load %arg7[%c0_14, %c0_15] : memref<1x12xf32, #tpu.memory_space<vmem>>, vector<1x12xf32>
    %cst_16 = arith.constant dense<0.000000e+00> : vector<8x12xf32>
    %17 = tpu.matmul %14, %15, %cst_16 {dimension_numbers = #tpu.dot_dimension_numbers<[1], [0], [0], [1], [0, 0, 1, 1], [], []>} : vector<8x64xf32>, vector<64x12xf32>, vector<8x12xf32> -> vector<8x12xf32>
    %18 = vector.broadcast %16 : vector<1x12xf32> to vector<8x12xf32>
    %19 = arith.addf %17, %18 : vector<8x12xf32>
    %cst_17 = arith.constant 0.000000e+00 : f32
    %20 = vector.broadcast %cst_17 : f32 to vector<8x12xf32>
    %21 = arith.maximumf %19, %20 : vector<8x12xf32>
    %c0_18 = arith.constant 0 : index
    %c0_19 = arith.constant 0 : index
    %22 = vector.load %arg8[%c0_18, %c0_19] : memref<12x3xf32, #tpu.memory_space<vmem>>, vector<12x3xf32>
    %c0_20 = arith.constant 0 : index
    %c0_21 = arith.constant 0 : index
    %23 = vector.load %arg9[%c0_20, %c0_21] : memref<1x3xf32, #tpu.memory_space<vmem>>, vector<1x3xf32>
    %cst_22 = arith.constant dense<0.000000e+00> : vector<8x3xf32>
    %24 = tpu.matmul %21, %22, %cst_22 {dimension_numbers = #tpu.dot_dimension_numbers<[1], [0], [0], [1], [0, 0, 1, 1], [], []>} : vector<8x12xf32>, vector<12x3xf32>, vector<8x3xf32> -> vector<8x3xf32>
    %25 = vector.broadcast %23 : vector<1x3xf32> to vector<8x3xf32>
    %26 = arith.addf %24, %25 : vector<8x3xf32>
    %c0_23 = arith.constant 0 : index
    %c0_24 = arith.constant 0 : index
    %27 = vector.load %arg18[%c0_23, %c0_24] : memref<8x3xf32, #tpu.memory_space<vmem>>, vector<8x3xf32>
    tpu.vector_store %arg18[%c0_23, %c0_24], %26 {strides = array<i32>} : memref<8x3xf32, #tpu.memory_space<vmem>>, vector<8x3xf32>,
    %c0_25 = arith.constant 0 : index
    %c0_26 = arith.constant 0 : index
    %28 = vector.load %arg10[%c0_25, %c0_26] : memref<3x12xf32, #tpu.memory_space<vmem>>, vector<3x12xf32>
    %c0_27 = arith.constant 0 : index
    %c0_28 = arith.constant 0 : index
    %29 = vector.load %arg11[%c0_27, %c0_28] : memref<1x12xf32, #tpu.memory_space<vmem>>, vector<1x12xf32>
    %cst_29 = arith.constant dense<0.000000e+00> : vector<8x12xf32>
    %30 = tpu.matmul %26, %28, %cst_29 {dimension_numbers = #tpu.dot_dimension_numbers<[1], [0], [0], [1], [0, 0, 1, 1], [], []>} : vector<8x3xf32>, vector<3x12xf32>, vector<8x12xf32> -> vector<8x12xf32>
    %31 = vector.broadcast %29 : vector<1x12xf32> to vector<8x12xf32>
    %32 = arith.addf %30, %31 : vector<8x12xf32>
    %cst_30 = arith.constant 0.000000e+00 : f32
    %33 = vector.broadcast %cst_30 : f32 to vector<8x12xf32>
    %34 = arith.maximumf %32, %33 : vector<8x12xf32>
    %c0_31 = arith.constant 0 : index
    %c0_32 = arith.constant 0 : index
    %35 = vector.load %arg12[%c0_31, %c0_32] : memref<12x64xf32, #tpu.memory_space<vmem>>, vector<12x64xf32>
    %c0_33 = arith.constant 0 : index
    %c0_34 = arith.constant 0 : index
    %36 = vector.load %arg13[%c0_33, %c0_34] : memref<1x64xf32, #tpu.memory_space<vmem>>, vector<1x64xf32>
    %cst_35 = arith.constant dense<0.000000e+00> : vector<8x64xf32>
    %37 = tpu.matmul %34, %35, %cst_35 {dimension_numbers = #tpu.dot_dimension_numbers<[1], [0], [0], [1], [0, 0, 1, 1], [], []>} : vector<8x12xf32>, vector<12x64xf32>, vector<8x64xf32> -> vector<8x64xf32>
    %38 = vector.broadcast %36 : vector<1x64xf32> to vector<8x64xf32>
    %39 = arith.addf %37, %38 : vector<8x64xf32>
    %cst_36 = arith.constant 0.000000e+00 : f32
    %40 = vector.broadcast %cst_36 : f32 to vector<8x64xf32>
    %41 = arith.maximumf %39, %40 : vector<8x64xf32>
    %c0_37 = arith.constant 0 : index
    %c0_38 = arith.constant 0 : index
    %42 = vector.load %arg14[%c0_37, %c0_38] : memref<64x128xf32, #tpu.memory_space<vmem>>, vector<64x128xf32>
    %c0_39 = arith.constant 0 : index
    %c0_40 = arith.constant 0 : index
    %43 = vector.load %arg15[%c0_39, %c0_40] : memref<1x128xf32, #tpu.memory_space<vmem>>, vector<1x128xf32>
    %cst_41 = arith.constant dense<0.000000e+00> : vector<8x128xf32>
    %44 = tpu.matmul %41, %42, %cst_41 {dimension_numbers = #tpu.dot_dimension_numbers<[1], [0], [0], [1], [0, 0, 1, 1], [], []>} : vector<8x64xf32>, vector<64x128xf32>, vector<8x128xf32> -> vector<8x128xf32>
    %45 = vector.broadcast %43 : vector<1x128xf32> to vector<8x128xf32>
    %46 = arith.addf %44, %45 : vector<8x128xf32>
    %cst_42 = arith.constant 0.000000e+00 : f32
    %47 = vector.broadcast %cst_42 : f32 to vector<8x128xf32>
    %48 = arith.maximumf %46, %47 : vector<8x128xf32>
    %c0_43 = arith.constant 0 : index
    %c0_44 = arith.constant 0 : index
    %49 = vector.load %arg16[%c0_43, %c0_44] : memref<128x784xf32, #tpu.memory_space<vmem>>, vector<128x784xf32>
    %c0_45 = arith.constant 0 : index
    %c0_46 = arith.constant 0 : index
    %50 = vector.load %arg17[%c0_45, %c0_46] : memref<1x784xf32, #tpu.memory_space<vmem>>, vector<1x784xf32>
    %cst_47 = arith.constant dense<0.000000e+00> : vector<8x784xf32>
    %51 = tpu.matmul %48, %49, %cst_47 {dimension_numbers = #tpu.dot_dimension_numbers<[1], [0], [0], [1], [0, 0, 1, 1], [], []>} : vector<8x128xf32>, vector<128x784xf32>, vector<8x784xf32> -> vector<8x784xf32>
    %52 = vector.broadcast %50 : vector<1x784xf32> to vector<8x784xf32>
    %53 = arith.addf %51, %52 : vector<8x784xf32>
    %54 = math.tanh %53 : vector<8x784xf32>
    %c0_48 = arith.constant 0 : index
    %c0_49 = arith.constant 0 : index
    %55 = vector.load %arg19[%c0_48, %c0_49] : memref<8x784xf32, #tpu.memory_space<vmem>>, vector<8x784xf32>
    tpu.vector_store %arg19[%c0_48, %c0_49], %54 {strides = array<i32>} : memref<8x784xf32, #tpu.memory_space<vmem>>, vector<8x784xf32>,
    return
  }
  func.func @transform_0(%arg0: i32) -> (i32, i32) {
    %c0_i32 = arith.constant 0 : i32
    %c0_i32_0 = arith.constant 0 : i32
    return %arg0, %c0_i32 : i32, i32
  }
  func.func @transform_1(%arg0: i32) -> (i32, i32) {
    %c0_i32 = arith.constant 0 : i32
    %c0_i32_0 = arith.constant 0 : i32
    %c0_i32_1 = arith.constant 0 : i32
    return %c0_i32, %c0_i32_0 : i32, i32
  }
  func.func @transform_2(%arg0: i32) -> (i32, i32) {
    %c0_i32 = arith.constant 0 : i32
    %c0_i32_0 = arith.constant 0 : i32
    %c0_i32_1 = arith.constant 0 : i32
    return %c0_i32, %c0_i32_0 : i32, i32
  }
  func.func @transform_3(%arg0: i32) -> (i32, i32) {
    %c0_i32 = arith.constant 0 : i32
    %c0_i32_0 = arith.constant 0 : i32
    %c0_i32_1 = arith.constant 0 : i32
    return %c0_i32, %c0_i32_0 : i32, i32
  }
  func.func @transform_4(%arg0: i32) -> (i32, i32) {
    %c0_i32 = arith.constant 0 : i32
    %c0_i32_0 = arith.constant 0 : i32
    %c0_i32_1 = arith.constant 0 : i32
    return %c0_i32, %c0_i32_0 : i32, i32
  }
  func.func @transform_5(%arg0: i32) -> (i32, i32) {
    %c0_i32 = arith.constant 0 : i32
    %c0_i32_0 = arith.constant 0 : i32
    %c0_i32_1 = arith.constant 0 : i32
    return %c0_i32, %c0_i32_0 : i32, i32
  }
  func.func @transform_6(%arg0: i32) -> (i32, i32) {
    %c0_i32 = arith.constant 0 : i32
    %c0_i32_0 = arith.constant 0 : i32
    %c0_i32_1 = arith.constant 0 : i32
    return %c0_i32, %c0_i32_0 : i32, i32
  }
  func.func @transform_7(%arg0: i32) -> (i32, i32) {
    %c0_i32 = arith.constant 0 : i32
    %c0_i32_0 = arith.constant 0 : i32
    %c0_i32_1 = arith.constant 0 : i32
    return %c0_i32, %c0_i32_0 : i32, i32
  }
  func.func @transform_8(%arg0: i32) -> (i32, i32) {
    %c0_i32 = arith.constant 0 : i32
    %c0_i32_0 = arith.constant 0 : i32
    %c0_i32_1 = arith.constant 0 : i32
    return %c0_i32, %c0_i32_0 : i32, i32
  }
  func.func @transform_9(%arg0: i32) -> (i32, i32) {
    %c0_i32 = arith.constant 0 : i32
    %c0_i32_0 = arith.constant 0 : i32
    %c0_i32_1 = arith.constant 0 : i32
    return %c0_i32, %c0_i32_0 : i32, i32
  }
  func.func @transform_10(%arg0: i32) -> (i32, i32) {
    %c0_i32 = arith.constant 0 : i32
    %c0_i32_0 = arith.constant 0 : i32
    %c0_i32_1 = arith.constant 0 : i32
    return %c0_i32, %c0_i32_0 : i32, i32
  }
  func.func @transform_11(%arg0: i32) -> (i32, i32) {
    %c0_i32 = arith.constant 0 : i32
    %c0_i32_0 = arith.constant 0 : i32
    %c0_i32_1 = arith.constant 0 : i32
    return %c0_i32, %c0_i32_0 : i32, i32
  }
  func.func @transform_12(%arg0: i32) -> (i32, i32) {
    %c0_i32 = arith.constant 0 : i32
    %c0_i32_0 = arith.constant 0 : i32
    %c0_i32_1 = arith.constant 0 : i32
    return %c0_i32, %c0_i32_0 : i32, i32
  }
  func.func @transform_13(%arg0: i32) -> (i32, i32) {
    %c0_i32 = arith.constant 0 : i32
    %c0_i32_0 = arith.constant 0 : i32
    %c0_i32_1 = arith.constant 0 : i32
    return %c0_i32, %c0_i32_0 : i32, i32
  }
  func.func @transform_14(%arg0: i32) -> (i32, i32) {
    %c0_i32 = arith.constant 0 : i32
    %c0_i32_0 = arith.constant 0 : i32
    %c0_i32_1 = arith.constant 0 : i32
    return %c0_i32, %c0_i32_0 : i32, i32
  }
  func.func @transform_15(%arg0: i32) -> (i32, i32) {
    %c0_i32 = arith.constant 0 : i32
    %c0_i32_0 = arith.constant 0 : i32
    %c0_i32_1 = arith.constant 0 : i32
    return %c0_i32, %c0_i32_0 : i32, i32
  }
  func.func @transform_16(%arg0: i32) -> (i32, i32) {
    %c0_i32 = arith.constant 0 : i32
    %c0_i32_0 = arith.constant 0 : i32
    %c0_i32_1 = arith.constant 0 : i32
    return %c0_i32, %c0_i32_0 : i32, i32
  }
  func.func @transform_17(%arg0: i32) -> (i32, i32) {
    %c0_i32 = arith.constant 0 : i32
    %c0_i32_0 = arith.constant 0 : i32
    return %arg0, %c0_i32 : i32, i32
  }
  func.func @transform_18(%arg0: i32) -> (i32, i32) {
    %c0_i32 = arith.constant 0 : i32
    %c0_i32_0 = arith.constant 0 : i32
    return %arg0, %c0_i32 : i32, i32
  }
}

</mosaic_0001>

<bundles_post_ra>
// kernel: autoencoder_forward.1
= control target key start
LH: loop header
LB: loop body
LE: loop exit
PB: predicated region body
PF: predicated region fallthrough
CT: control target
= control target key end

     0   :  { %vm170_vm0 = vcmask 130048   ;;  %vm1778_vm1 = vmmov 0   ;;  %vm564_vm2 = vcmask 523264   ;;  %vm652_vm3 = vcmask 1043456   ;;  %s2772_s1 = inlined_call_operand.vmem [shape: f32[784,128], index: 1, kind: input, shape index: {}]   ;;  %s2773_s0 = inlined_call_operand.vmem [shape: f32[8,784], index: 0, kind: input, shape index: {}]   ;;  %s2774_s3 = inlined_call_operand.vmem [shape: f32[128,64], index: 3, kind: input, shape index: {}]   ;;  %s2775_s5 = inlined_call_operand.vmem [shape: f32[64,12], index: 5, kind: input, shape index: {}]   ;;  %s2776_s2 = inlined_call_operand.vmem [shape: f32[1,128], index: 2, kind: input, shape index: {}]   ;;  %s2777_s4 = inlined_call_operand.vmem [shape: f32[1,64], index: 4, kind: input, shape index: {}]   ;;  %s2778_s7 = inlined_call_operand.vmem [shape: f32[12,3], index: 7, kind: input, shape index: {}]   ;;  %s2779_s6 = inlined_call_operand.vmem [shape: f32[1,12], index: 6, kind: input, shape index: {}]   ;;  %s2780_s9 = inlined_call_operand.vmem [shape: f32[3,12], index: 9, kind: input, shape index: {}]   ;;  %s2781_s8 = inlined_call_operand.vmem [shape: f32[1,3], index: 8, kind: input, shape index: {}]   ;;  %s2782_s17 = inlined_call_operand.vmem [shape: f32[8,3], index: 17, kind: output, shape index: {0}]   ;;  %s2783_s11 = inlined_call_operand.vmem [shape: f32[12,64], index: 11, kind: input, shape index: {}]   ;;  %s2784_s13 = inlined_call_operand.vmem [shape: f32[64,128], index: 13, kind: input, shape index: {}]   ;;  %s2785_s10 = inlined_call_operand.vmem [shape: f32[1,12], index: 10, kind: input, shape index: {}]   ;;  %s2786_s15 = inlined_call_operand.vmem [shape: f32[128,784], index: 15, kind: input, shape index: {}]   ;;  %s2787_s12 = inlined_call_operand.vmem [shape: f32[1,64], index: 12, kind: input, shape index: {}]   ;;  %s2788_s14 = inlined_call_operand.vmem [shape: f32[1,128], index: 14, kind: input, shape index: {}]   ;;  %s2789_s16 = inlined_call_operand.vmem [shape: f32[1,784], index: 16, kind: input, shape index: {}]   ;;  %s2790_s18 = inlined_call_operand.vmem [shape: f32[8,784], index: 18, kind: output, shape index: {1}]  }
   0x1   :  { %2794 = sst [smem:[#allocation2_spill]] %s2772_s1  ;;  %vm648_vm4 = vcmask 97280   ;;  %vm739_vm5 = vcmask 1042432   ;;  %vm726_vm6 = vcmask 23552  }
   0x2   :  { %2795 = sst [smem:[#allocation3_spill]] %s2773_s0 }
   0x3   :  { %2796 = sst [smem:[#allocation4_spill]] %s2774_s3 }
   0x4   :  { %s2797_s29 = sld [smem:[#allocation2_spill]] }
   0x5   :  { %s2798_s23 = sld [smem:[#allocation3_spill]] }
   0x6   :  { %s2799_s3 = sld [smem:[#allocation4_spill]] }
   0xa   :  { %v96_v0 = vld [vmem:[%s2797_s29 + $0xf8] sm:$0xff]  ;;  %v95_v2 = vld [vmem:[%s2797_s29 + $0xf0] sm:$0xff]  ;;  %v94_v6 = vld [vmem:[%s2797_s29 + $0xe8] sm:$0xff] }
   0xb   :  { %v80_v1 = vld [vmem:[%s2797_s29 + $0x78] sm:$0xff]  ;;  %1459 = vmatprep.subr.mxu0 %v96_v0  ;;  %v79_v4 = vld [vmem:[%s2797_s29 + $0x70] sm:$0xff]  ;;  %v78_v8 = vld [vmem:[%s2797_s29 + $0x68] sm:$0xff] }
   0xc   :  { %v128_v3 = vld [vmem:[%s2797_s29 + $0x1f8] sm:$0xff]  ;;  %1460 = vmatpush3.msra.mxu0 %v80_v1  ;;  %v127_v7 = vld [vmem:[%s2797_s29 + $0x1f0] sm:$0xff]  ;;  %v126_v10 = vld [vmem:[%s2797_s29 + $0x1e8] sm:$0xff] }
   0xd   :  { %v112_v5 = vld [vmem:[%s2797_s29 + $0x178] sm:$0xff]  ;;  %1494 = vmatprep.subr.mxu1 %v128_v3  ;;  %1461 = vmatprep.subr.mxu0 %v95_v2  ;;  %v111_v9 = vld [vmem:[%s2797_s29 + $0x170] sm:$0xff]  ;;  %v93_v11 = vld [vmem:[%s2797_s29 + $0xe0] sm:$0xff] }
   0xe   :  { %1495 = vmatpush3.msra.mxu1 %v112_v5  ;;  %1462 = vmatpush3.msra.mxu0 %v79_v4  ;;  %v110_v12 = vld [vmem:[%s2797_s29 + $0x168] sm:$0xff]  ;;  %v77_v13 = vld [vmem:[%s2797_s29 + $0x60] sm:$0xff]  ;;  %v92_v15 = vld [vmem:[%s2797_s29 + $0xd8] sm:$0xff] }
   0xf   :  { %1496 = vmatprep.subr.mxu1 %v127_v7  ;;  %1463 = vmatprep.subr.mxu0 %v94_v6  ;;  %v125_v14 = vld [vmem:[%s2797_s29 + $0x1e0] sm:$0xff]  ;;  %v76_v17 = vld [vmem:[%s2797_s29 + $0x58] sm:$0xff]  ;;  %v91_v19 = vld [vmem:[%s2797_s29 + $0xd0] sm:$0xff] }
  0x10   :  { %1497 = vmatpush3.msra.mxu1 %v111_v9  ;;  %1464 = vmatpush3.msra.mxu0 %v78_v8  ;;  %v109_v16 = vld [vmem:[%s2797_s29 + $0x160] sm:$0xff]  ;;  %v124_v18 = vld [vmem:[%s2797_s29 + $0x1d8] sm:$0xff]  ;;  %v75_v21 = vld [vmem:[%s2797_s29 + $0x50] sm:$0xff] }
  0x11   :  { %1498 = vmatprep.subr.mxu1 %v126_v10  ;;  %1465 = vmatprep.subr.mxu0 %v93_v11  ;;  %v108_v20 = vld [vmem:[%s2797_s29 + $0x158] sm:$0xff]  ;;  %v123_v22 = vld [vmem:[%s2797_s29 + $0x1d0] sm:$0xff]  ;;  %v90_v23 = vld [vmem:[%s2797_s29 + $0xc8] sm:$0xff] }
  0x12   :  { %1499 = vmatpush3.msra.mxu1 %v110_v12  ;;  %1466 = vmatpush3.msra.mxu0 %v77_v13  ;;  %v107_v24 = vld [vmem:[%s2797_s29 + $0x150] sm:$0xff]  ;;  %v74_v25 = vld [vmem:[%s2797_s29 + $0x48] sm:$0xff]  ;;  %v89_v27 = vld [vmem:[%s2797_s29 + $0xc0] sm:$0xff] }
  0x13   :  { %1500 = vmatprep.subr.mxu1 %v125_v14  ;;  %1467 = vmatprep.subr.mxu0 %v92_v15  ;;  %v122_v26 = vld [vmem:[%s2797_s29 + $0x1c8] sm:$0xff]  ;;  %v73_v29 = vld [vmem:[%s2797_s29 + $0x40] sm:$0xff]  ;;  %v88_v31 = vld [vmem:[%s2797_s29 + $0xb8] sm:$0xff]  ;;  %v1777_v14 = vmov 0.0  }
  0x14   :  { %1501 = vmatpush3.msra.mxu1 %v109_v16  ;;  %1468 = vmatpush3.msra.mxu0 %v76_v17  ;;  %v106_v28 = vld [vmem:[%s2797_s29 + $0x148] sm:$0xff]  ;;  %v121_v30 = vld [vmem:[%s2797_s29 + $0x1c0] sm:$0xff]  ;;  %v72_v33 = vld [vmem:[%s2797_s29 + $0x38] sm:$0xff] }
  0x15   :  { %1502 = vmatprep.subr.mxu1 %v124_v18  ;;  %1469 = vmatprep.subr.mxu0 %v91_v19  ;;  %v105_v32 = vld [vmem:[%s2797_s29 + $0x140] sm:$0xff]  ;;  %v120_v34 = vld [vmem:[%s2797_s29 + $0x1b8] sm:$0xff]  ;;  %v87_v35 = vld [vmem:[%s2797_s29 + $0xb0] sm:$0xff] }
  0x16   :  { %1503 = vmatpush3.msra.mxu1 %v108_v20  ;;  %1470 = vmatpush3.msra.mxu0 %v75_v21  ;;  %v104_v36 = vld [vmem:[%s2797_s29 + $0x138] sm:$0xff]  ;;  %v71_v37 = vld [vmem:[%s2797_s29 + $0x30] sm:$0xff]  ;;  %v86_v39 = vld [vmem:[%s2797_s29 + $0xa8] sm:$0xff] }
  0x17   :  { %1504 = vmatprep.subr.mxu1 %v123_v22  ;;  %1471 = vmatprep.subr.mxu0 %v90_v23  ;;  %v119_v38 = vld [vmem:[%s2797_s29 + $0x1b0] sm:$0xff]  ;;  %v70_v41 = vld [vmem:[%s2797_s29 + $0x28] sm:$0xff]  ;;  %v85_v43 = vld [vmem:[%s2797_s29 + $0xa0] sm:$0xff] }
  0x18   :  { %1505 = vmatpush3.msra.mxu1 %v107_v24  ;;  %1472 = vmatpush3.msra.mxu0 %v74_v25  ;;  %v103_v40 = vld [vmem:[%s2797_s29 + $0x130] sm:$0xff]  ;;  %v118_v42 = vld [vmem:[%s2797_s29 + $0x1a8] sm:$0xff]  ;;  %v69_v45 = vld [vmem:[%s2797_s29 + $0x20] sm:$0xff] }
  0x19   :  { %1506 = vmatprep.subr.mxu1 %v122_v26  ;;  %1473 = vmatprep.subr.mxu0 %v89_v27  ;;  %v102_v44 = vld [vmem:[%s2797_s29 + $0x128] sm:$0xff]  ;;  %v117_v46 = vld [vmem:[%s2797_s29 + $0x1a0] sm:$0xff]  ;;  %v84_v47 = vld [vmem:[%s2797_s29 + $0x98] sm:$0xff] }
  0x1a   :  { %1507 = vmatpush3.msra.mxu1 %v106_v28  ;;  %1474 = vmatpush3.msra.mxu0 %v73_v29  ;;  %v101_v48 = vld [vmem:[%s2797_s29 + $0x120] sm:$0xff]  ;;  %v68_v49 = vld [vmem:[%s2797_s29 + $0x18] sm:$0xff]  ;;  %v83_v51 = vld [vmem:[%s2797_s29 + $0x90] sm:$0xff] }
  0x1b   :  { %1508 = vmatprep.subr.mxu1 %v121_v30  ;;  %1475 = vmatprep.subr.mxu0 %v88_v31  ;;  %v116_v50 = vld [vmem:[%s2797_s29 + $0x198] sm:$0xff]  ;;  %v67_v53 = vld [vmem:[%s2797_s29 + $0x10] sm:$0xff]  ;;  %v82_v55 = vld [vmem:[%s2797_s29 + $0x88] sm:$0xff] }
  0x1c   :  { %1509 = vmatpush3.msra.mxu1 %v105_v32  ;;  %1476 = vmatpush3.msra.mxu0 %v72_v33  ;;  %v100_v52 = vld [vmem:[%s2797_s29 + $0x118] sm:$0xff]  ;;  %v115_v54 = vld [vmem:[%s2797_s29 + $0x190] sm:$0xff]  ;;  %v66_v57 = vld [vmem:[%s2797_s29 + $0x8] sm:$0xff] }
  0x1d   :  { %1510 = vmatprep.subr.mxu1 %v120_v34  ;;  %1477 = vmatprep.subr.mxu0 %v87_v35  ;;  %v99_v56 = vld [vmem:[%s2797_s29 + $0x110] sm:$0xff]  ;;  %v114_v58 = vld [vmem:[%s2797_s29 + $0x188] sm:$0xff]  ;;  %v81_v59 = vld [vmem:[%s2797_s29 + $0x80] sm:$0xff] }
  0x1e   :  { %1511 = vmatpush3.msra.mxu1 %v104_v36  ;;  %1478 = vmatpush3.msra.mxu0 %v71_v37  ;;  %v59_v60 = vld [vmem:[%s2798_s23 + $0x8] sm:$0xff]  ;;  %v65_v61 = vld [vmem:[%s2797_s29] sm:$0xff]  ;;  %v160_v1 = vld [vmem:[%s2797_s29 + $0x2f8] sm:$0xff] }
  0x1f   :  { %1512 = vmatprep.subr.mxu1 %v119_v38  ;;  %1479 = vmatprep.subr.mxu0 %v86_v39  ;;  %v98_v62 = vld [vmem:[%s2797_s29 + $0x108] sm:$0xff]  ;;  %v58_v63 = vld [vmem:[%s2798_s23] sm:$0xff]  ;;  %v61_v3 = vld [vmem:[%s2798_s23 + $0x18] sm:$0xff] }
  0x20   :  { %1513 = vmatpush3.msra.mxu1 %v103_v40  ;;  %1480 = vmatpush3.msra.mxu0 %v70_v41  ;;  %v113_v0 = vld [vmem:[%s2797_s29 + $0x180] sm:$0xff]  ;;  %v144_v4 = vld [vmem:[%s2797_s29 + $0x278] sm:$0xff]  ;;  %v60_v5 = vld [vmem:[%s2798_s23 + $0x10] sm:$0xff] }
  0x21   :  { %1514 = vmatprep.subr.mxu1 %v118_v42  ;;  %1481 = vmatprep.subr.mxu0 %v85_v43  ;;  %v97_v2 = vld [vmem:[%s2797_s29 + $0x100] sm:$0xff]  ;;  %v159_v6 = vld [vmem:[%s2797_s29 + $0x2f0] sm:$0xff]  ;;  %v63_v8 = vld [vmem:[%s2798_s23 + $0x28] sm:$0xff] }
  0x22   :  { %1515 = vmatpush3.msra.mxu1 %v102_v44  ;;  %1482 = vmatpush3.msra.mxu0 %v69_v45  ;;  %v143_v7 = vld [vmem:[%s2797_s29 + $0x270] sm:$0xff]  ;;  %v158_v9 = vld [vmem:[%s2797_s29 + $0x2e8] sm:$0xff]  ;;  %v157_v12 = vld [vmem:[%s2797_s29 + $0x2e0] sm:$0xff] }
  0x23   :  { %1516 = vmatprep.subr.mxu1 %v117_v46  ;;  %1483 = vmatprep.subr.mxu0 %v84_v47  ;;  %v142_v10 = vld [vmem:[%s2797_s29 + $0x268] sm:$0xff]  ;;  %v141_v13 = vld [vmem:[%s2797_s29 + $0x260] sm:$0xff]  ;;  %v156_v16 = vld [vmem:[%s2797_s29 + $0x2d8] sm:$0xff] }
  0x24   :  { %1517 = vmatpush3.msra.mxu1 %v101_v48  ;;  %1484 = vmatpush3.msra.mxu0 %v68_v49  ;;  %v162_v11 = vld [vmem:[%s2797_s29 + $0x308] sm:$0xff]  ;;  %v161_v15 = vld [vmem:[%s2797_s29 + $0x300] sm:$0xff]  ;;  %v140_v17 = vld [vmem:[%s2797_s29 + $0x258] sm:$0xff] }
  0x25   :  { %1518 = vmatprep.subr.mxu1 %v116_v50  ;;  %1485 = vmatprep.subr.mxu0 %v83_v51  ;;  %v64_v18 = vld [vmem:[%s2798_s23 + $0x30] sm:$0xff]  ;;  %v154_v21 = vld [vmem:[%s2797_s29 + $0x2c8] sm:$0xff]  ;;  %v153_v23 = vld [vmem:[%s2797_s29 + $0x2c0] sm:$0xff] }
  0x26   :  { %1519 = vmatpush3.msra.mxu1 %v100_v52  ;;  %1486 = vmatpush3.msra.mxu0 %v67_v53  ;;  %v155_v19 = vld [vmem:[%s2797_s29 + $0x2d0] sm:$0xff]  ;;  %v138_v22 = vld [vmem:[%s2797_s29 + $0x248] sm:$0xff]  ;;  %v137_v24 = vld [vmem:[%s2797_s29 + $0x240] sm:$0xff] }
  0x27   :  { %1520 = vmatprep.subr.mxu1 %v115_v54  ;;  %1487 = vmatprep.subr.mxu0 %v82_v55  ;;  %v139_v20 = vld [vmem:[%s2797_s29 + $0x250] sm:$0xff]  ;;  %v152_v25 = vld [vmem:[%s2797_s29 + $0x2b8] sm:$0xff]  ;;  %v150_v29 = vld [vmem:[%s2797_s29 + $0x2a8] sm:$0xff] }
  0x28   :  { %1521 = vmatpush3.msra.mxu1 %v99_v56  ;;  %1488 = vmatpush3.msra.mxu0 %v66_v57  ;;  %v136_v26 = vld [vmem:[%s2797_s29 + $0x238] sm:$0xff]  ;;  %v151_v27 = vld [vmem:[%s2797_s29 + $0x2b0] sm:$0xff]  ;;  %v134_v30 = vld [vmem:[%s2797_s29 + $0x228] sm:$0xff] }
  0x29   :  { %1522 = vmatprep.subr.mxu1 %v114_v58  ;;  %1489 = vmatprep.subr.mxu0 %v81_v59  ;;  %v135_v28 = vld [vmem:[%s2797_s29 + $0x230] sm:$0xff]  ;;  %v149_v31 = vld [vmem:[%s2797_s29 + $0x2a0] sm:$0xff]  ;;  %v148_v33 = vld [vmem:[%s2797_s29 + $0x298] sm:$0xff] }
  0x2a   :  { %238 = vmatprep.mubr.f32.mxu0 %v59_v60  ;;  %1490 = vmatpush3.msra.mxu0 %v65_v61  ;;  %v133_v32 = vld [vmem:[%s2797_s29 + $0x220] sm:$0xff]  ;;  %v132_v34 = vld [vmem:[%s2797_s29 + $0x218] sm:$0xff]  ;;  %v147_v35 = vld [vmem:[%s2797_s29 + $0x290] sm:$0xff] }
  0x2b   :  { %1523 = vmatpush3.msra.mxu1 %v98_v62  ;;  %239 = vmatmul.mubr.f32.vlgmr.msra.gmra.mxu0 %v58_v63  ;;  %v131_v36 = vld [vmem:[%s2797_s29 + $0x210] sm:$0xff]  ;;  %v146_v37 = vld [vmem:[%s2797_s29 + $0x288] sm:$0xff]  ;;  %v145_v39 = vld [vmem:[%s2797_s29 + $0x280] sm:$0xff] }
  0x2c   :  { %1524 = vmatprep.subr.mxu1 %v113_v0  ;;  %1529 = vmatprep.subr.mxu0 %v160_v1  ;;  %v130_v38 = vld [vmem:[%s2797_s29 + $0x208] sm:$0xff]  ;;  %v129_v40 = vld [vmem:[%s2797_s29 + $0x200] sm:$0xff]  ;;  %v470_v42 = vld [vmem:[%s2799_s3 + $0x78] sm:$0xff] }
  0x2d   :  { %1525 = vmatpush3.msra.mxu1 %v97_v2  ;;  %308 = vmatprep.mubr.f32.mxu1 %v61_v3  ;;  %v62_v41 = vld [vmem:[%s2798_s23 + $0x20] sm:$0xff]  ;;  %v469_v43 = vld [vmem:[%s2799_s3 + $0x70] sm:$0xff]  ;;  %v468_v44 = vld [vmem:[%s2799_s3 + $0x68] sm:$0xff] }
  0x2e   :  { %1530 = vmatpush3.msra.mxu0 %v144_v4  ;;  %309 = vmatmul.mubr.f32.vlgmr.msra.gmra.mxu1 %v60_v5  ;;  %v467_v45 = vld [vmem:[%s2799_s3 + $0x60] sm:$0xff]  ;;  %v466_v46 = vld [vmem:[%s2799_s3 + $0x58] sm:$0xff]  ;;  %v465_v47 = vld [vmem:[%s2799_s3 + $0x50] sm:$0xff] }
  0x2f   :  { %1531 = vmatprep.subr.mxu0 %v159_v6  ;;  %378 = vmatprep.mubr.f32.mxu0 %v63_v8  ;;  %v464_v48 = vld [vmem:[%s2799_s3 + $0x48] sm:$0xff]  ;;  %v463_v49 = vld [vmem:[%s2799_s3 + $0x40] sm:$0xff]  ;;  %v462_v50 = vld [vmem:[%s2799_s3 + $0x38] sm:$0xff] }
  0x30   :  { %1532 = vmatpush3.msra.mxu0 %v143_v7  ;;  %1627 = vmatprep.subr.mxu1 %v1777_v14  ;;  %v461_v51 = vld [vmem:[%s2799_s3 + $0x30] sm:$0xff]  ;;  %v460_v52 = vld [vmem:[%s2799_s3 + $0x28] sm:$0xff]  ;;  %v459_v53 = vld [vmem:[%s2799_s3 + $0x20] sm:$0xff] }
  0x31   :  { %1533 = vmatprep.subr.mxu0 %v158_v9  ;;  %1628 = vmatpush3.msra.mxu1 %v162_v11  ;;  %v458_v54 = vld [vmem:[%s2799_s3 + $0x18] sm:$0xff]  ;;  %v457_v55 = vld [vmem:[%s2799_s3 + $0x10] sm:$0xff]  ;;  %v456_v56 = vld [vmem:[%s2799_s3 + $0x8] sm:$0xff] }
  0x32   :  { %1534 = vmatpush3.msra.mxu0 %v142_v10  ;;  %1629 = vmatprep.subr.mxu1 %v1777_v14  ;;  %v455_v57 = vld [vmem:[%s2799_s3] sm:$0xff]  ;;  %v556_v58 = vld [vmem:[%s2775_s5 + $0x38] sm:$0xff]  ;;  %v555_v59 = vld [vmem:[%s2775_s5 + $0x30] sm:$0xff] }
  0x33   :  { %1535 = vmatprep.subr.mxu0 %v157_v12  ;;  %1630 = vmatpush3.msra.mxu1 %v161_v15  ;;  %v554_v60 = vld [vmem:[%s2775_s5 + $0x28] sm:$0xff]  ;;  %v553_v61 = vld [vmem:[%s2775_s5 + $0x20] sm:$0xff]  ;;  %v552_v62 = vld [vmem:[%s2775_s5 + $0x18] sm:$0xff] }
  0x34   :  { %1536 = vmatpush3.msra.mxu0 %v141_v13  ;;  %1631 = vmatprep.mubr.msk.f32.mxu1 %vm1778_vm1, %v1777_v14  ;;  %v1443_v6 = vld [vmem:[%s2776_s2] ss:$0 sm:$0xff] }
  0x35   :  { %1537 = vmatprep.subr.mxu0 %v156_v16  ;;  %1632 = vmatmul.mubr.msk.f32.vlgmr.msra.gmra.mxu1 %vm170_vm0, %v64_v18  ;;  %v550_v18 = vld [vmem:[%s2775_s5 + $0x8] sm:$0xff] }
  0x36   :  { %1538 = vmatpush3.msra.mxu0 %v140_v17  ;;  %1634 = vmatprep.subr.mxu1 %v1777_v14  ;;  %v551_v17 = vld [vmem:[%s2775_s5 + $0x10] sm:$0xff] }
  0x37   :  { %1539 = vmatprep.subr.mxu0 %v155_v19  ;;  %1666 = vmatprep.mubr.msk.f32.mxu1 %vm1778_vm1, %v1777_v14  ;;  %v549_v19 = vld [vmem:[%s2775_s5] sm:$0xff] }
  0x38   :  { %1540 = vmatpush3.msra.mxu0 %v139_v20  ;;  %1635 = vmatpush3.msra.mxu1 %v470_v42  ;;  %v1445_v20 = vld [vmem:[%s2777_s4] ss:$0 sm:$0xff] }
  0x39   :  { %1541 = vmatprep.subr.mxu0 %v154_v21  ;;  %1636 = vmatprep.subr.mxu1 %v1777_v14  ;;  %v904_v42 = vld [vmem:[%s2784_s13 + $0x20] sm:$0xff] }
  0x3a   :  { %1542 = vmatpush3.msra.mxu0 %v138_v22  ;;  %1637 = vmatpush3.msra.mxu1 %v469_v43  ;;  %v903_v43 = vld [vmem:[%s2784_s13 + $0x18] sm:$0xff] }
  0x3b   :  { %1543 = vmatprep.subr.mxu0 %v153_v23  ;;  %1638 = vmatprep.subr.mxu1 %v1777_v14 }
  0x3c   :  { %1544 = vmatpush3.msra.mxu0 %v137_v24  ;;  %1639 = vmatpush3.msra.mxu1 %v468_v44  ;;  %v1451_v44 = vld [vmem:[%s2785_s10] ss:$0 sm:$0xff] }
  0x3d   :  { %1545 = vmatprep.subr.mxu0 %v152_v25  ;;  %1640 = vmatprep.subr.mxu1 %v1777_v14  ;;  %v640_v25 = vld [vmem:[%s2778_s7 + $0x8] sm:$0xf] }
  0x3e   :  { %1546 = vmatpush3.msra.mxu0 %v136_v26  ;;  %1641 = vmatpush3.msra.mxu1 %v467_v45  ;;  %v639_v26 = vld [vmem:[%s2778_s7] sm:$0xff] }
  0x3f   :  { %1547 = vmatprep.subr.mxu0 %v151_v27  ;;  %1642 = vmatprep.subr.mxu1 %v1777_v14  ;;  %v1446_v27 = vld [vmem:[%s2779_s6] ss:$0 sm:$0xff] }
  0x40   :  { %1548 = vmatpush3.msra.mxu0 %v135_v28  ;;  %1643 = vmatpush3.msra.mxu1 %v466_v46 }
  0x41   :  { %1549 = vmatprep.subr.mxu0 %v150_v29  ;;  %1644 = vmatprep.subr.mxu1 %v1777_v14 }
  0x42   :  { %1550 = vmatpush3.msra.mxu0 %v134_v30  ;;  %1645 = vmatpush3.msra.mxu1 %v465_v47 }
  0x43   :  { %1551 = vmatprep.subr.mxu0 %v149_v31  ;;  %1646 = vmatprep.subr.mxu1 %v1777_v14 }
  0x44   :  { %1552 = vmatpush3.msra.mxu0 %v133_v32  ;;  %1647 = vmatpush3.msra.mxu1 %v464_v48  ;;  %v728_v32 = vld [vmem:[%s2780_s9] sm:$0x7] }
  0x45   :  { %1553 = vmatprep.subr.mxu0 %v148_v33  ;;  %1648 = vmatprep.subr.mxu1 %v1777_v14  ;;  %v1448_v33 = vld [vmem:[%s2781_s8] ss:$0 sm:$0xff] }
  0x46   :  { %1554 = vmatpush3.msra.mxu0 %v132_v34  ;;  %1649 = vmatpush3.msra.mxu1 %v463_v49  ;;  %v902_v49 = vld [vmem:[%s2784_s13 + $0x10] sm:$0xff] }
  0x47   :  { %1555 = vmatprep.subr.mxu0 %v147_v35  ;;  %1650 = vmatprep.subr.mxu1 %v1777_v14 }
  0x48   :  { %1556 = vmatpush3.msra.mxu0 %v131_v36  ;;  %1651 = vmatpush3.msra.mxu1 %v462_v50  ;;  %v901_v50 = vld [vmem:[%s2784_s13 + $0x8] sm:$0xff] }
  0x49   :  { %1557 = vmatprep.subr.mxu0 %v146_v37  ;;  %1652 = vmatprep.subr.mxu1 %v1777_v14  ;;  %v815_v37 = vld [vmem:[%s2783_s11 + $0x8] sm:$0xf] }
  0x4a   :  { %1558 = vmatpush3.msra.mxu0 %v130_v38  ;;  %1653 = vmatpush3.msra.mxu1 %v461_v51  ;;  %v814_v38 = vld [vmem:[%s2783_s11] sm:$0xff] }
  0x4b   :  { %1559 = vmatprep.subr.mxu0 %v145_v39  ;;  %1654 = vmatprep.subr.mxu1 %v1777_v14  ;;  %v907_v39 = vld [vmem:[%s2784_s13 + $0x38] sm:$0xff]  ;;  %v900_v51 = vld [vmem:[%s2784_s13] sm:$0xff] }
  0x4c   :  { %1560 = vmatpush3.msra.mxu0 %v129_v40  ;;  %1655 = vmatpush3.msra.mxu1 %v460_v52  ;;  %v906_v40 = vld [vmem:[%s2784_s13 + $0x30] sm:$0xff] }
  0x4d   :  { %379 = vmatmul.mubr.f32.vlgmr.msra.gmra.mxu0 %v62_v41  ;;  %1669 = vmatprep.subr.mxu0 %v1777_v14  ;;  %v905_v41 = vld [vmem:[%s2784_s13 + $0x28] sm:$0xff]  ;;  %v1095_v52 = vld [vmem:[%s2786_s15 + $0x350] sm:$0xff] }
  0x4e   :  { %1685 = vmatprep.mubr.msk.f32.mxu0 %vm1778_vm1, %v1777_v14  ;;  %1656 = vmatprep.subr.mxu1 %v1777_v14 }
  0x4f   :  { %1657 = vmatpush3.msra.mxu1 %v459_v53  ;;  %1670 = vmatpush3.msra.mxu0 %v556_v58  ;;  %v1097_v53 = vld [vmem:[%s2786_s15 + $0x360] sm:$0xff]  ;;  %v1080_v58 = vld [vmem:[%s2786_s15 + $0x2d8] sm:$0xff] }
  0x50   :  { %1658 = vmatprep.subr.mxu1 %v1777_v14  ;;  %1671 = vmatprep.subr.mxu0 %v1777_v14 }
  0x51   :  { %1659 = vmatpush3.msra.mxu1 %v458_v54  ;;  %1672 = vmatpush3.msra.mxu0 %v555_v59  ;;  %v1094_v54 = vld [vmem:[%s2786_s15 + $0x348] sm:$0xff] }
  0x52   :  { %1660 = vmatprep.subr.mxu1 %v1777_v14  ;;  %1673 = vmatprep.subr.mxu0 %v1777_v14  ;;  %v1074_v59 = vld [vmem:[%s2786_s15 + $0x2a8] sm:$0xff] }
  0x53   :  { %1661 = vmatpush3.msra.mxu1 %v457_v55  ;;  %1674 = vmatpush3.msra.mxu0 %v554_v60  ;;  %v1088_v55 = vld [vmem:[%s2786_s15 + $0x318] sm:$0xff]  ;;  %v1073_v60 = vld [vmem:[%s2786_s15 + $0x2a0] sm:$0xff] }
  0x54   :  { %1662 = vmatprep.subr.mxu1 %v1777_v14  ;;  %1675 = vmatprep.subr.mxu0 %v1777_v14 }
  0x55   :  { %1663 = vmatpush3.msra.mxu1 %v456_v56  ;;  %1676 = vmatpush3.msra.mxu0 %v553_v61  ;;  %v1087_v56 = vld [vmem:[%s2786_s15 + $0x310] sm:$0xff] }
  0x56   :  { %1664 = vmatprep.subr.mxu1 %v1777_v14  ;;  %1677 = vmatprep.subr.mxu0 %v1777_v14  ;;  %v1067_v61 = vld [vmem:[%s2786_s15 + $0x270] sm:$0xff] }
  0x57   :  { %1665 = vmatpush3.msra.mxu1 %v455_v57  ;;  %1678 = vmatpush3.msra.mxu0 %v552_v62  ;;  %v1081_v57 = vld [vmem:[%s2786_s15 + $0x2e0] sm:$0xff]  ;;  %v1066_v62 = vld [vmem:[%s2786_s15 + $0x268] sm:$0xff] }
  0x58   :  { %1688 = vmatprep.subr.mxu1 %v1777_v14  ;;  %1679 = vmatprep.subr.mxu0 %v1777_v14 }
  0x59   :  { %1680 = vmatpush3.msra.mxu0 %v551_v17  ;;  %v1003_v17 = vld [vmem:[%s2786_s15 + $0x70] sm:$0xff] }
  0x5a   :  { %1681 = vmatprep.subr.mxu0 %v1777_v14 }
  0x5b   :  { %1682 = vmatpush3.msra.mxu0 %v550_v18  ;;  %v1454_v18 = vld [vmem:[%s2787_s12] ss:$0 sm:$0xff] }
  0x5c   :  { %1683 = vmatprep.subr.mxu0 %v1777_v14 }
  0x5d   :  { %1684 = vmatpush3.msra.mxu0 %v549_v19 }
  0x5e   :  { %1707 = vmatprep.subr.mxu0 %v1777_v14 }
  0xeb   :  { %v1491_v3 = vpop.f32.mrf.mxu0 }
  0xed   :  { %v1492_v4 = vpop.f32.mrf.mxu0 }
  0xee   :  { %v1526_v63 = vpop.f32.mrf.mxu1  ;;  %v1493_v5 = vadd.f32 %v1492_v4, %v1491_v3  ;;  %v1046_v3 = vld [vmem:[%s2786_s15 + $0x1c8] sm:$0xff]  ;;  %v1045_v4 = vld [vmem:[%s2786_s15 + $0x1c0] sm:$0xff] }
  0xf0   :  { %v1527_v0 = vpop.f32.mrf.mxu1  ;;  %v241_v7 = vadd.f32 %v1493_v5, %v1443_v6  ;;  %v1039_v5 = vld [vmem:[%s2786_s15 + $0x190] sm:$0xff]  ;;  %v1038_v6 = vld [vmem:[%s2786_s15 + $0x188] sm:$0xff] }
  0xf1   :  { %v1528_v8 = vadd.f32 %v1527_v0, %v1526_v63  ;;  %v1060_v63 = vld [vmem:[%s2786_s15 + $0x238] sm:$0xff]  ;;  %v1059_v0 = vld [vmem:[%s2786_s15 + $0x230] sm:$0xff] }
  0xf3   :  { %v311_v11 = vadd.f32 %v1528_v8, %v241_v7  ;;  %v1032_v7 = vld [vmem:[%s2786_s15 + $0x158] sm:$0xff]  ;;  %v1031_v8 = vld [vmem:[%s2786_s15 + $0x150] sm:$0xff] }
  0xf5   :  { %v450_v1 = vpop.f32.mrf.mxu1 }
  0xf7   :  { %v1633_v2 = vpop.f32.mrf.mxu1 }
  0xf8   :  { %v1052_v2 = vld [vmem:[%s2786_s15 + $0x1f8] sm:$0xff] }
 0x10d   :  { %v1561_v9 = vpop.f32.mrf.mxu0 }
 0x10f   :  { %v1562_v10 = vpop.f32.mrf.mxu0 }
 0x110   :  { %v1563_v12 = vadd.f32 %v1562_v10, %v1561_v9  ;;  %v1025_v9 = vld [vmem:[%s2786_s15 + $0x120] sm:$0xff]  ;;  %v1024_v10 = vld [vmem:[%s2786_s15 + $0x118] sm:$0xff] }
 0x112   :  { %v381_v13 = vadd.f32 %v1563_v12, %v311_v11  ;;  %v1018_v11 = vld [vmem:[%s2786_s15 + $0xe8] sm:$0xff]  ;;  %v1017_v12 = vld [vmem:[%s2786_s15 + $0xe0] sm:$0xff] }
 0x114   :  { %v451_v15 = vadd.f32 %v450_v1, %v381_v13  ;;  %v1053_v1 = vld [vmem:[%s2786_s15 + $0x200] sm:$0xff]  ;;  %v1011_v13 = vld [vmem:[%s2786_s15 + $0xb0] sm:$0xff] }
 0x116   :  { %v454_v16 = vmax.f32 %v451_v15, 0.0  ;;  %v1010_v15 = vld [vmem:[%s2786_s15 + $0xa8] sm:$0xff] }
 0x118   :  { %1667 = vmatmul.mubr.f32.vlgmr.msra.gmra.mxu1 %v454_v16  ;;  %v1004_v16 = vld [vmem:[%s2786_s15 + $0x78] sm:$0xff] }
 0x119   :  { %1692 = vmatprep.mubr.msk.f32.mxu1 %vm1778_vm1, %v1777_v14  ;;  %1689 = vmatpush3.msk.msra.mxu1 %vm652_vm3, %v640_v25  ;;  %v1089_v25 = vld [vmem:[%s2786_s15 + $0x320] sm:$0xff] }
 0x11a   :  { %1690 = vmatprep.subr.mxu1 %v1777_v14 }
 0x11b   :  { %1691 = vmatpush3.msra.mxu1 %v639_v26  ;;  %v1083_v26 = vld [vmem:[%s2786_s15 + $0x2f0] sm:$0xff] }
 0x11c   :  { %1695 = vmatprep.subr.mxu1 %v1777_v14 }
 0x1d8   :  { %v544_v21 = vpop.f32.mrf.mxu1 }
 0x1d9   :  { %v545_v22 = vadd.f32 %v1445_v20, %v544_v21 }
 0x1da   :  { %v1668_v23 = vpop.f32.mrf.mxu1 }
 0x1db   :  { %v548_v24 = vmax.f32 %v545_v22, 0.0  ;;  %v1096_v23 = vld [vmem:[%s2786_s15 + $0x358] sm:$0xff] }
 0x1dd   :  { %1686 = vmatmul.mubr.msk.f32.vlgmr.msra.gmra.mxu0 %vm564_vm2, %v548_v24  ;;  %v1090_v24 = vld [vmem:[%s2786_s15 + $0x328] sm:$0xff] }
 0x1de   :  { %1723 = vmatprep.mubr.msk.f32.mxu0 %vm1778_vm1, %v1777_v14  ;;  %1708 = vmatpush3.msra.mxu0 %v907_v39  ;;  %v1040_v39 = vld [vmem:[%s2786_s15 + $0x198] sm:$0xff] }
 0x1df   :  { %1709 = vmatprep.subr.mxu0 %v1777_v14 }
 0x1e0   :  { %1710 = vmatpush3.msra.mxu0 %v906_v40  ;;  %v1034_v40 = vld [vmem:[%s2786_s15 + $0x168] sm:$0xff] }
 0x1e1   :  { %1711 = vmatprep.subr.mxu0 %v1777_v14 }
 0x1e2   :  { %1712 = vmatpush3.msra.mxu0 %v905_v41  ;;  %v1033_v41 = vld [vmem:[%s2786_s15 + $0x160] sm:$0xff] }
 0x1e3   :  { %1713 = vmatprep.subr.mxu0 %v1777_v14 }
 0x1e4   :  { %1714 = vmatpush3.msra.mxu0 %v904_v42  ;;  %v1027_v42 = vld [vmem:[%s2786_s15 + $0x130] sm:$0xff] }
 0x1e5   :  { %1715 = vmatprep.subr.mxu0 %v1777_v14 }
 0x1e6   :  { %1716 = vmatpush3.msra.mxu0 %v903_v43  ;;  %v1026_v43 = vld [vmem:[%s2786_s15 + $0x128] sm:$0xff] }
 0x1e7   :  { %1717 = vmatprep.subr.mxu0 %v1777_v14 }
 0x1e8   :  { %1718 = vmatpush3.msra.mxu0 %v902_v49  ;;  %v1005_v49 = vld [vmem:[%s2786_s15 + $0x80] sm:$0xff] }
 0x1e9   :  { %1719 = vmatprep.subr.mxu0 %v1777_v14 }
 0x1ea   :  { %1720 = vmatpush3.msra.mxu0 %v901_v50  ;;  %v997_v50 = vld [vmem:[%s2786_s15 + $0x40] sm:$0xff] }
 0x1eb   :  { %1721 = vmatprep.subr.mxu0 %v1777_v14 }
 0x1ec   :  { %1722 = vmatpush3.msra.mxu0 %v900_v51  ;;  %v999_v51 = vld [vmem:[%s2786_s15 + $0x50] sm:$0xff] }
 0x1ed   :  { %1209 = vmatprep.subr.mxu0 %v1097_v53  ;;  %v998_v53 = vld [vmem:[%s2786_s15 + $0x48] sm:$0xff] }
 0x29d   :  { %v634_v28 = vpop.f32.mrf.mxu0 }
 0x29e   :  { %v635_v29 = vadd.f32 %v1446_v27, %v634_v28  ;;  %v1082_v27 = vld [vmem:[%s2786_s15 + $0x2e8] sm:$0xff]  ;;  %v1076_v28 = vld [vmem:[%s2786_s15 + $0x2b8] sm:$0xff] }
 0x29f   :  { %v1687_v30 = vpop.f32.mrf.mxu0 }
 0x2a0   :  { %v638_v31 = vmax.f32 %v635_v29, 0.0  ;;  %v1075_v29 = vld [vmem:[%s2786_s15 + $0x2b0] sm:$0xff]  ;;  %v1069_v30 = vld [vmem:[%s2786_s15 + $0x280] sm:$0xff] }
 0x2a2   :  { %1693 = vmatmul.mubr.msk.f32.vlgmr.msra.gmra.mxu1 %vm648_vm4, %v638_v31  ;;  %v1068_v31 = vld [vmem:[%s2786_s15 + $0x278] sm:$0xff] }
 0x2a3   :  { %1696 = vmatpush3.msk.msra.mxu1 %vm739_vm5, %v728_v32  ;;  %1697 = vmatprep.mubr.msk.f32.mxu1 %vm1778_vm1, %v1777_v14  ;;  %v1062_v32 = vld [vmem:[%s2786_s15 + $0x248] sm:$0xff] }
 0x2a4   :  { %1700 = vmatprep.subr.mxu1 %v1777_v14 }
 0x362   :  { %v722_v34 = vpop.f32.mrf.mxu1 }
 0x363   :  { %v723_v35 = vadd.f32 %v1448_v33, %v722_v34  ;;  %v1061_v33 = vld [vmem:[%s2786_s15 + $0x240] sm:$0xff]  ;;  %v1055_v34 = vld [vmem:[%s2786_s15 + $0x210] sm:$0xff] }
 0x364   :  { %v1694_v36 = vpop.f32.mrf.mxu1 }
 0x365   :  { %727 = vst.msk [vmem:[%s2782_s17] sm:$0xff] %vm726_vm6, %v723_v35  ;;  %1698 = vmatmul.mubr.msk.f32.vlgmr.msra.gmra.mxu1 %vm726_vm6, %v723_v35  ;;  %v1054_v35 = vld [vmem:[%s2786_s15 + $0x208] sm:$0xff]  ;;  %v1048_v36 = vld [vmem:[%s2786_s15 + $0x1d8] sm:$0xff] }
 0x366   :  { %1704 = vmatprep.mubr.msk.f32.mxu1 %vm1778_vm1, %v1777_v14  ;;  %1701 = vmatpush3.msk.msra.mxu1 %vm652_vm3, %v815_v37  ;;  %v1047_v37 = vld [vmem:[%s2786_s15 + $0x1d0] sm:$0xff] }
 0x367   :  { %1702 = vmatprep.subr.mxu1 %v1777_v14 }
 0x368   :  { %1703 = vmatpush3.msra.mxu1 %v814_v38  ;;  %v1041_v38 = vld [vmem:[%s2786_s15 + $0x1a0] sm:$0xff] }
 0x369   :  { %1138 = vmatprep.subr.mxu1 %v1095_v52  ;;  %v996_v52 = vld [vmem:[%s2786_s15 + $0x38] sm:$0xff] }
 0x425   :  { %v809_v45 = vpop.f32.mrf.mxu1 }
 0x426   :  { %v810_v46 = vadd.f32 %v1451_v44, %v809_v45  ;;  %v1020_v44 = vld [vmem:[%s2786_s15 + $0xf8] sm:$0xff]  ;;  %v1019_v45 = vld [vmem:[%s2786_s15 + $0xf0] sm:$0xff] }
 0x427   :  { %v1699_v47 = vpop.f32.mrf.mxu1 }
 0x428   :  { %v813_v48 = vmax.f32 %v810_v46, 0.0  ;;  %v1013_v46 = vld [vmem:[%s2786_s15 + $0xc0] sm:$0xff]  ;;  %v1012_v47 = vld [vmem:[%s2786_s15 + $0xb8] sm:$0xff] }
 0x42a   :  { %1705 = vmatmul.mubr.msk.f32.vlgmr.msra.gmra.mxu1 %vm648_vm4, %v813_v48  ;;  %v1006_v48 = vld [vmem:[%s2786_s15 + $0x88] sm:$0xff] }
 0x42b   :  { %1202 = vmatprep.mubr.f32.mxu1 %v1777_v14  ;;  %1139 = vmatpush1.msra.mxu1 %v1094_v54  ;;  %v990_v54 = vld [vmem:[%s2786_s15 + $0x8] sm:$0xff] }
 0x42c   :  { %1140 = vmatprep.subr.mxu1 %v1088_v55  ;;  %v992_v55 = vld [vmem:[%s2786_s15 + $0x18] sm:$0xff] }
 0x42d   :  { %1141 = vmatpush1.msra.mxu1 %v1087_v56  ;;  %v989_v56 = vld [vmem:[%s2786_s15] sm:$0xff] }
 0x42e   :  { %1142 = vmatprep.subr.mxu1 %v1081_v57  ;;  %v991_v57 = vld [vmem:[%s2786_s15 + $0x10] sm:$0xff] }
 0x42f   :  { %1143 = vmatpush1.msra.mxu1 %v1080_v58  ;;  %v1099_v58 = vld [vmem:[%s2786_s15 + $0x370] sm:$0xff] }
 0x430   :  { %1144 = vmatprep.subr.mxu1 %v1074_v59  ;;  %v1457_v59 = vld [vmem:[%s2788_s14] ss:$0 sm:$0xff] }
 0x431   :  { %1145 = vmatpush1.msra.mxu1 %v1073_v60 }
 0x432   :  { %1146 = vmatprep.subr.mxu1 %v1067_v61 }
 0x433   :  { %1147 = vmatpush1.msra.mxu1 %v1066_v62 }
 0x434   :  { %1148 = vmatprep.subr.mxu1 %v1060_v63 }
 0x435   :  { %1149 = vmatpush1.msra.mxu1 %v1059_v0  ;;  %v1098_v0 = vld [vmem:[%s2786_s15 + $0x368] sm:$0xff] }
 0x436   :  { %1150 = vmatprep.subr.mxu1 %v1053_v1  ;;  %v1100_v1 = vld [vmem:[%s2786_s15 + $0x378] sm:$0xff] }
 0x437   :  { %1151 = vmatpush1.msra.mxu1 %v1052_v2  ;;  %v1092_v2 = vld [vmem:[%s2786_s15 + $0x338] sm:$0xff] }
 0x438   :  { %1152 = vmatprep.subr.mxu1 %v1046_v3  ;;  %v1091_v3 = vld [vmem:[%s2786_s15 + $0x330] sm:$0xff] }
 0x439   :  { %1153 = vmatpush1.msra.mxu1 %v1045_v4  ;;  %v1093_v4 = vld [vmem:[%s2786_s15 + $0x340] sm:$0xff] }
 0x43a   :  { %1154 = vmatprep.subr.mxu1 %v1039_v5  ;;  %v1085_v5 = vld [vmem:[%s2786_s15 + $0x300] sm:$0xff] }
 0x43b   :  { %1155 = vmatpush1.msra.mxu1 %v1038_v6  ;;  %v1084_v6 = vld [vmem:[%s2786_s15 + $0x2f8] sm:$0xff] }
 0x43c   :  { %1156 = vmatprep.subr.mxu1 %v1032_v7  ;;  %v1086_v7 = vld [vmem:[%s2786_s15 + $0x308] sm:$0xff] }
 0x43d   :  { %1157 = vmatpush1.msra.mxu1 %v1031_v8  ;;  %v1078_v8 = vld [vmem:[%s2786_s15 + $0x2c8] sm:$0xff] }
 0x43e   :  { %1158 = vmatprep.subr.mxu1 %v1025_v9  ;;  %v1077_v9 = vld [vmem:[%s2786_s15 + $0x2c0] sm:$0xff] }
 0x43f   :  { %1159 = vmatpush1.msra.mxu1 %v1024_v10  ;;  %v1079_v10 = vld [vmem:[%s2786_s15 + $0x2d0] sm:$0xff] }
 0x440   :  { %1160 = vmatprep.subr.mxu1 %v1018_v11  ;;  %v1071_v11 = vld [vmem:[%s2786_s15 + $0x290] sm:$0xff] }
 0x441   :  { %1161 = vmatpush1.msra.mxu1 %v1017_v12  ;;  %v1070_v12 = vld [vmem:[%s2786_s15 + $0x288] sm:$0xff] }
 0x442   :  { %1162 = vmatprep.subr.mxu1 %v1011_v13  ;;  %v1072_v13 = vld [vmem:[%s2786_s15 + $0x298] sm:$0xff] }
 0x443   :  { %1163 = vmatpush1.msra.mxu1 %v1010_v15  ;;  %v1064_v15 = vld [vmem:[%s2786_s15 + $0x258] sm:$0xff] }
 0x444   :  { %1164 = vmatprep.subr.mxu1 %v1004_v16  ;;  %v1063_v16 = vld [vmem:[%s2786_s15 + $0x250] sm:$0xff] }
 0x445   :  { %1165 = vmatpush1.msra.mxu1 %v1003_v17  ;;  %v1065_v17 = vld [vmem:[%s2786_s15 + $0x260] sm:$0xff] }
 0x446   :  { %1166 = vmatprep.subr.mxu1 %v997_v50 }
 0x447   :  { %1167 = vmatpush1.msra.mxu1 %v996_v52  ;;  %v1101_v52 = vld [vmem:[%s2789_s16] sm:$0x7f] }
 0x448   :  { %1168 = vmatprep.subr.mxu1 %v990_v54 }
 0x449   :  { %1169 = vmatpush1.msra.mxu1 %v989_v56 }
 0x44a   :  { %1280 = vmatprep.subr.mxu1 %v1099_v58 }
 0x4ea   :  { %v895_v19 = vpop.f32.mrf.mxu1 }
 0x4eb   :  { %v896_v20 = vadd.f32 %v1454_v18, %v895_v19  ;;  %v1057_v18 = vld [vmem:[%s2786_s15 + $0x220] sm:$0xff]  ;;  %v1056_v19 = vld [vmem:[%s2786_s15 + $0x218] sm:$0xff] }
 0x4ec   :  { %v1706_v21 = vpop.f32.mrf.mxu1 }
 0x4ed   :  { %v899_v22 = vmax.f32 %v896_v20, 0.0  ;;  %v1058_v20 = vld [vmem:[%s2786_s15 + $0x228] sm:$0xff] }
 0x4ee   :  { %v1050_v21 = vld [vmem:[%s2786_s15 + $0x1e8] sm:$0xff] }
 0x4ef   :  { %1724 = vmatmul.mubr.msk.f32.vlgmr.msra.gmra.mxu0 %vm564_vm2, %v899_v22  ;;  %v1049_v22 = vld [vmem:[%s2786_s15 + $0x1e0] sm:$0xff] }
 0x4f0   :  { %1210 = vmatpush1.msra.mxu0 %v1096_v23  ;;  %1273 = vmatprep.mubr.f32.mxu0 %v1777_v14  ;;  %v1051_v23 = vld [vmem:[%s2786_s15 + $0x1f0] sm:$0xff] }
 0x4f1   :  { %1211 = vmatprep.subr.mxu0 %v1090_v24  ;;  %v1043_v24 = vld [vmem:[%s2786_s15 + $0x1b0] sm:$0xff] }
 0x4f2   :  { %1212 = vmatpush1.msra.mxu0 %v1089_v25  ;;  %v1042_v25 = vld [vmem:[%s2786_s15 + $0x1a8] sm:$0xff] }
 0x4f3   :  { %1213 = vmatprep.subr.mxu0 %v1083_v26  ;;  %v1044_v26 = vld [vmem:[%s2786_s15 + $0x1b8] sm:$0xff] }
 0x4f4   :  { %1214 = vmatpush1.msra.mxu0 %v1082_v27  ;;  %v1036_v27 = vld [vmem:[%s2786_s15 + $0x178] sm:$0xff] }
 0x4f5   :  { %1215 = vmatprep.subr.mxu0 %v1076_v28  ;;  %v1035_v28 = vld [vmem:[%s2786_s15 + $0x170] sm:$0xff] }
 0x4f6   :  { %1216 = vmatpush1.msra.mxu0 %v1075_v29  ;;  %v1037_v29 = vld [vmem:[%s2786_s15 + $0x180] sm:$0xff] }
 0x4f7   :  { %1217 = vmatprep.subr.mxu0 %v1069_v30  ;;  %v1029_v30 = vld [vmem:[%s2786_s15 + $0x140] sm:$0xff] }
 0x4f8   :  { %1218 = vmatpush1.msra.mxu0 %v1068_v31  ;;  %v1028_v31 = vld [vmem:[%s2786_s15 + $0x138] sm:$0xff] }
 0x4f9   :  { %1219 = vmatprep.subr.mxu0 %v1062_v32  ;;  %v1030_v32 = vld [vmem:[%s2786_s15 + $0x148] sm:$0xff] }
 0x4fa   :  { %1220 = vmatpush1.msra.mxu0 %v1061_v33  ;;  %v1022_v33 = vld [vmem:[%s2786_s15 + $0x108] sm:$0xff] }
 0x4fb   :  { %1221 = vmatprep.subr.mxu0 %v1055_v34  ;;  %v1021_v34 = vld [vmem:[%s2786_s15 + $0x100] sm:$0xff] }
 0x4fc   :  { %1222 = vmatpush1.msra.mxu0 %v1054_v35  ;;  %v1023_v35 = vld [vmem:[%s2786_s15 + $0x110] sm:$0xff] }
 0x4fd   :  { %1223 = vmatprep.subr.mxu0 %v1048_v36  ;;  %v1015_v36 = vld [vmem:[%s2786_s15 + $0xd0] sm:$0xff] }
 0x4fe   :  { %1224 = vmatpush1.msra.mxu0 %v1047_v37  ;;  %v1014_v37 = vld [vmem:[%s2786_s15 + $0xc8] sm:$0xff] }
 0x4ff   :  { %1225 = vmatprep.subr.mxu0 %v1041_v38  ;;  %v1016_v38 = vld [vmem:[%s2786_s15 + $0xd8] sm:$0xff] }
 0x500   :  { %1226 = vmatpush1.msra.mxu0 %v1040_v39  ;;  %v1008_v39 = vld [vmem:[%s2786_s15 + $0x98] sm:$0xff] }
 0x501   :  { %1227 = vmatprep.subr.mxu0 %v1034_v40  ;;  %v1007_v40 = vld [vmem:[%s2786_s15 + $0x90] sm:$0xff] }
 0x502   :  { %1228 = vmatpush1.msra.mxu0 %v1033_v41  ;;  %v1009_v41 = vld [vmem:[%s2786_s15 + $0xa0] sm:$0xff] }
 0x503   :  { %1229 = vmatprep.subr.mxu0 %v1027_v42  ;;  %v1001_v42 = vld [vmem:[%s2786_s15 + $0x60] sm:$0xff] }
 0x504   :  { %1230 = vmatpush1.msra.mxu0 %v1026_v43  ;;  %v1000_v43 = vld [vmem:[%s2786_s15 + $0x58] sm:$0xff] }
 0x505   :  { %1231 = vmatprep.subr.mxu0 %v1020_v44  ;;  %v1002_v44 = vld [vmem:[%s2786_s15 + $0x68] sm:$0xff] }
 0x506   :  { %1232 = vmatpush1.msra.mxu0 %v1019_v45  ;;  %v994_v45 = vld [vmem:[%s2786_s15 + $0x28] sm:$0xff] }
 0x507   :  { %1233 = vmatprep.subr.mxu0 %v1013_v46  ;;  %v993_v46 = vld [vmem:[%s2786_s15 + $0x20] sm:$0xff] }
 0x508   :  { %1234 = vmatpush1.msra.mxu0 %v1012_v47  ;;  %v995_v47 = vld [vmem:[%s2786_s15 + $0x30] sm:$0xff] }
 0x509   :  { %1235 = vmatprep.subr.mxu0 %v1006_v48  ;;  %v1103_v48 = vlaneseq }
 0x50a   :  { %1236 = vmatpush1.msra.mxu0 %v1005_v49 }
 0x50b   :  { %1237 = vmatprep.subr.mxu0 %v999_v51  ;;  %v1104_v49 = vshrl.u32 %v1103_v48, 7 }
 0x50c   :  { %1238 = vmatpush1.msra.mxu0 %v998_v53 }
 0x50d   :  { %1239 = vmatprep.subr.mxu0 %v992_v55  ;;  %v1105_v50 = vsub.s32 0, %v1104_v49  ;;  %v1113_v51 = vsub.s32 2, %v1104_v49  ;;  %v1109_v53 = vsub.s32 1, %v1104_v49  ;;  %v1117_v54 = vsub.s32 3, %v1104_v49 }
 0x50e   :  { %1240 = vmatpush1.msra.mxu0 %v991_v57 }
 0x50f   :  { %1726 = vmatprep.subr.mxu0 %v1777_v14  ;;  %v1106_v55 = vrot.slane %v1101_v52, %v1105_v50  ;;  %v1114_v56 = vrot.slane %v1101_v52, %v1113_v51  ;;  %v1110_v57 = vrot.slane %v1101_v52, %v1109_v53  ;;  %v1118_v58 = vrot.slane %v1101_v52, %v1117_v54 }
 0x5af   :  { %v984_v60 = vpop.f32.mrf.mxu0 }
 0x5b0   :  { %v985_v61 = vadd.f32 %v1457_v59, %v984_v60 }
 0x5b1   :  { %v1725_v62 = vpop.f32.mrf.mxu0 }
 0x5b2   :  { %v2582_v63 = vmax.f32 %v985_v61, 0.0 }
 0x5b4   :  { %1203 = vmatmul.mubr.f32.vlgmr.msra.gmra.mxu1 %v2582_v63  ;;  %1274 = vmatmul.mubr.f32.vlgmr.msra.gmra.mxu0 %v2582_v63 }
 0x5b5   :  { %1281 = vmatpush1.msra.mxu1 %v1098_v0  ;;  %1727 = vmatpush3.msra.mxu0 %v1100_v1 }
 0x5b6   :  { %1282 = vmatprep.subr.mxu1 %v1092_v2  ;;  %1728 = vmatprep.subr.mxu0 %v1777_v14 }
 0x5b7   :  { %1283 = vmatpush1.msra.mxu1 %v1091_v3  ;;  %1729 = vmatpush3.msra.mxu0 %v1093_v4 }
 0x5b8   :  { %1284 = vmatprep.subr.mxu1 %v1085_v5  ;;  %1730 = vmatprep.subr.mxu0 %v1777_v14 }
 0x5b9   :  { %1285 = vmatpush1.msra.mxu1 %v1084_v6  ;;  %1731 = vmatpush3.msra.mxu0 %v1086_v7  ;;  %v1121_v6 = vsub.s32 4, %v1104_v49  ;;  %v1129_v7 = vsub.s32 6, %v1104_v49 }
 0x5ba   :  { %1286 = vmatprep.subr.mxu1 %v1078_v8  ;;  %1732 = vmatprep.subr.mxu0 %v1777_v14  ;;  %v1125_v8 = vsub.s32 5, %v1104_v49 }
 0x5bb   :  { %1287 = vmatpush1.msra.mxu1 %v1077_v9  ;;  %1733 = vmatpush3.msra.mxu0 %v1079_v10  ;;  %v1122_v9 = vrot.slane %v1101_v52, %v1121_v6  ;;  %v1130_v10 = vrot.slane %v1101_v52, %v1129_v7 }
 0x5bc   :  { %1288 = vmatprep.subr.mxu1 %v1071_v11  ;;  %1734 = vmatprep.subr.mxu0 %v1777_v14  ;;  %v1126_v11 = vrot.slane %v1101_v52, %v1125_v8 }
 0x5bd   :  { %1289 = vmatpush1.msra.mxu1 %v1070_v12  ;;  %1735 = vmatpush3.msra.mxu0 %v1072_v13 }
 0x5be   :  { %1290 = vmatprep.subr.mxu1 %v1064_v15  ;;  %1736 = vmatprep.subr.mxu0 %v1777_v14 }
 0x5bf   :  { %1291 = vmatpush1.msra.mxu1 %v1063_v16  ;;  %1737 = vmatpush3.msra.mxu0 %v1065_v17 }
 0x5c0   :  { %1292 = vmatprep.subr.mxu1 %v1057_v18  ;;  %1738 = vmatprep.subr.mxu0 %v1777_v14 }
 0x5c1   :  { %1293 = vmatpush1.msra.mxu1 %v1056_v19  ;;  %1739 = vmatpush3.msra.mxu0 %v1058_v20 }
 0x5c2   :  { %1294 = vmatprep.subr.mxu1 %v1050_v21  ;;  %1740 = vmatprep.subr.mxu0 %v1777_v14 }
 0x5c3   :  { %1295 = vmatpush1.msra.mxu1 %v1049_v22  ;;  %1741 = vmatpush3.msra.mxu0 %v1051_v23 }
 0x5c4   :  { %1296 = vmatprep.subr.mxu1 %v1043_v24  ;;  %1742 = vmatprep.subr.mxu0 %v1777_v14 }
 0x5c5   :  { %1297 = vmatpush1.msra.mxu1 %v1042_v25  ;;  %1743 = vmatpush3.msra.mxu0 %v1044_v26 }
 0x5c6   :  { %1298 = vmatprep.subr.mxu1 %v1036_v27  ;;  %1744 = vmatprep.subr.mxu0 %v1777_v14 }
 0x5c7   :  { %1299 = vmatpush1.msra.mxu1 %v1035_v28  ;;  %1745 = vmatpush3.msra.mxu0 %v1037_v29 }
 0x5c8   :  { %1300 = vmatprep.subr.mxu1 %v1029_v30  ;;  %1746 = vmatprep.subr.mxu0 %v1777_v14 }
 0x5c9   :  { %1301 = vmatpush1.msra.mxu1 %v1028_v31  ;;  %1747 = vmatpush3.msra.mxu0 %v1030_v32 }
 0x5ca   :  { %1302 = vmatprep.subr.mxu1 %v1022_v33  ;;  %1748 = vmatprep.subr.mxu0 %v1777_v14 }
 0x5cb   :  { %1303 = vmatpush1.msra.mxu1 %v1021_v34  ;;  %1749 = vmatpush3.msra.mxu0 %v1023_v35 }
 0x5cc   :  { %1304 = vmatprep.subr.mxu1 %v1015_v36  ;;  %1750 = vmatprep.subr.mxu0 %v1777_v14 }
 0x5cd   :  { %1305 = vmatpush1.msra.mxu1 %v1014_v37  ;;  %1751 = vmatpush3.msra.mxu0 %v1016_v38 }
 0x5ce   :  { %1306 = vmatprep.subr.mxu1 %v1008_v39  ;;  %1752 = vmatprep.subr.mxu0 %v1777_v14 }
 0x5cf   :  { %1307 = vmatpush1.msra.mxu1 %v1007_v40  ;;  %1753 = vmatpush3.msra.mxu0 %v1009_v41 }
 0x5d0   :  { %1308 = vmatprep.subr.mxu1 %v1001_v42  ;;  %1754 = vmatprep.subr.mxu0 %v1777_v14 }
 0x5d1   :  { %1309 = vmatpush1.msra.mxu1 %v1000_v43  ;;  %1755 = vmatpush3.msra.mxu0 %v1002_v44 }
 0x5d2   :  { %1310 = vmatprep.subr.mxu1 %v994_v45  ;;  %1756 = vmatprep.subr.mxu0 %v1777_v14 }
 0x5d3   :  { %1311 = vmatpush1.msra.mxu1 %v993_v46  ;;  %1344 = vmatprep.mubr.f32.mxu1 %v1777_v14 }
 0x5d4   :  { %1757 = vmatpush3.msra.mxu0 %v995_v47  ;;  %1758 = vmatprep.mubr.msk.f32.mxu0 %vm1778_vm1, %v1777_v14 }
 0x5d5   :  { %1345 = vmatmul.mubr.f32.vlgmr.msra.gmra.mxu1 %v2582_v63  ;;  %1759 = vmatmul.mubr.f32.vlgmr.msra.gmra.mxu0 %v2582_v63 }
 0x674   :  { %v1204_v59 = vpop.f32.mrf.mxu1  ;;  %v1275_v14 = vpop.f32.mrf.mxu0 }
 0x675   :  { %v1205_v60 = vadd.f32 %v1204_v59, %v1106_v55  ;;  %v1276_v61 = vadd.f32 %v1275_v14, %v1114_v56 }
 0x676   :  { %v1206_v62 = vpop.f32.mrf.mxu1  ;;  %v1277_v63 = vpop.f32.mrf.mxu0 }
 0x677   :  { %1763 = vtanh.f32 %v1205_v60  ;;  %v1207_v0 = vadd.f32 %v1206_v62, %v1110_v57  ;;  %v1278_v1 = vadd.f32 %v1277_v63, %v1118_v58 }
 0x678   :  { %1765 = vtanh.f32 %v1276_v61 }
 0x679   :  { %1767 = vtanh.f32 %v1207_v0 }
 0x67a   :  { %1769 = vtanh.f32 %v1278_v1 }
 0x684   :  { %v1764_v2 = vpop.eup %1763 }
 0x685   :  { %v1766_v3 = vpop.eup %1765  ;;  %1428 = vst [vmem:[%s2790_s18] sm:$0xff] %v1764_v2 }
 0x686   :  { %v1768_v4 = vpop.eup %1767  ;;  %1430 = vst [vmem:[%s2790_s18 + $0x10] sm:$0xff] %v1766_v3 }
 0x687   :  { %v1770_v5 = vpop.eup %1769  ;;  %1429 = vst [vmem:[%s2790_s18 + $0x8] sm:$0xff] %v1768_v4 }
 0x688   :  { %1431 = vst [vmem:[%s2790_s18 + $0x18] sm:$0xff] %v1770_v5 }
 0x695   :  { %v1346_v12 = vpop.f32.mrf.mxu1  ;;  %v1417_v13 = vpop.f32.mrf.mxu0 }
 0x696   :  { %v1347_v15 = vadd.f32 %v1346_v12, %v1122_v9  ;;  %v1418_v16 = vadd.f32 %v1417_v13, %v1130_v10 }
 0x697   :  { %v1348_v17 = vpop.f32.mrf.mxu1  ;;  %v1760_v18 = vpop.f32.mrf.mxu0 }
 0x698   :  { %1771 = vtanh.f32 %v1347_v15  ;;  %v1349_v19 = vadd.f32 %v1348_v17, %v1126_v11 }
 0x699   :  { %1773 = vtanh.f32 %v1418_v16 }
 0x69a   :  { %1775 = vtanh.f32 %v1349_v19 }
 0x6a5   :  { %v1772_v20 = vpop.eup %1771 }
 0x6a6   :  { %v1774_v21 = vpop.eup %1773  ;;  %1432 = vst [vmem:[%s2790_s18 + $0x20] sm:$0xff] %v1772_v20 }
 0x6a7   :  { %v1776_v22 = vpop.eup %1775  ;;  %1434 = vst.msk [vmem:[%s2790_s18 + $0x30] sm:$0xff] %vm170_vm0, %v1774_v21 }
 0x6a8   :  { %1433 = vst [vmem:[%s2790_s18 + $0x28] sm:$0xff] %v1776_v22 }

</bundles_post_ra>
